<compile_context>
chip_gen: v6e
topology: v6e:2x2x1
jax: 0.10.0
libtpu: 0.0.40
codegen_flags: <defaults>
</compile_context>

<pallas_src>
import functools

import jax
import jax.numpy as jnp
from jax import lax
from jax.experimental import pallas as pl
from jax.experimental.pallas import tpu as pltpu


_NEG_BIG = -1e30  # finite "-inf" so masked lanes never create inf-inf = NaN


def _ls_ce_kernel(x_ref, pk_ref, o_ref, m_ref, l_ref, sx_ref, *,
                  num_classes, tile_c, epsilon):
    """One (batch-tile, class-tile) grid step of label-smoothed CE.

    x_ref  : (TILE_N, TILE_C) logits tile (input dtype, cast to f32 in VMEM)
    pk_ref : (TILE_N, 1) f32 picked (target) logits, gathered in XLA
    o_ref  : (TILE_N, 1) f32 per-row loss (written on last class step)
    m/l/sx : (TILE_N, 1) f32 VMEM scratch carried across the class axis
             (running max, running sum-exp, running sum of logits)
    """
    j = pl.program_id(1)
    last = pl.num_programs(1) - 1
    c_rem = num_classes % tile_c  # static; > 0 only if the last class tile is partial

    @pl.when(j == 0)
    def _init():
        m_ref[...] = jnp.full(m_ref.shape, _NEG_BIG, dtype=jnp.float32)
        l_ref[...] = jnp.zeros(l_ref.shape, dtype=jnp.float32)
        sx_ref[...] = jnp.zeros(sx_ref.shape, dtype=jnp.float32)

    def _update(masked):
        x = x_ref[...].astype(jnp.float32)                       # (TILE_N, TILE_C)
        if masked:
            # Loop-invariant local iota vs. static remainder (only emitted for the
            # last, partial class tile).
            col = lax.broadcasted_iota(jnp.int32, x.shape, 1)
            valid = col < c_rem
            x_for_max = jnp.where(valid, x, _NEG_BIG)
        else:
            x_for_max = x

        m_prev = m_ref[...]                                      # (TILE_N, 1)
        m_new = jnp.maximum(m_prev, jnp.max(x_for_max, axis=1, keepdims=True))
        p = jnp.exp(x - m_new)
        if masked:
            # Select AFTER the exp (never multiply-by-mask: inf*0 = NaN).
            p = jnp.where(valid, p, 0.0)
            xs = jnp.where(valid, x, 0.0)
        else:
            xs = x
        l_ref[...] = (l_ref[...] * jnp.exp(m_prev - m_new)
                      + jnp.sum(p, axis=1, keepdims=True))
        m_ref[...] = m_new
        sx_ref[...] += jnp.sum(xs, axis=1, keepdims=True)

    if c_rem == 0:
        # Static fast path: no masking code emitted anywhere.
        _update(masked=False)
    else:
        @pl.when(j != last)
        def _interior():
            _update(masked=False)

        @pl.when(j == last)
        def _edge():
            _update(masked=True)

    @pl.when(j == last)
    def _finalize():
        lse = m_ref[...] + jnp.log(l_ref[...])                   # (TILE_N, 1)
        c_f = float(num_classes)
        # loss_row = -(1-eps)*(x[t] - lse) - (eps/C)*(sum_c x[c] - C*lse)
        o_ref[...] = (-(1.0 - epsilon) * (pk_ref[...] - lse)
                      - (epsilon / c_f) * (sx_ref[...] - c_f * lse))


def _round_up(x, m):
    return (x + m - 1) // m * m


def _vmem_limit_bytes():
    """Per-generation scoped-VMEM limit with headroom (v5e/v6e 128 MiB, v7x 64 MiB)."""
    cap = 64 * 1024 * 1024
    try:
        info = pltpu.get_tpu_info()
        cap = int(getattr(info, "vmem_capacity_bytes", cap))
    except Exception:
        pass
    return min(3 * cap // 4, 64 * 1024 * 1024)


def cross_entropy_label_smooth(inputs, targets, *, num_classes, epsilon,
                               max_tile_n=256, max_tile_c=8192):
    """inputs: (N, C) float logits; targets: (N,) int labels -> scalar f32 loss."""
    n, c = inputs.shape
    assert c == num_classes

    itemsize = jnp.dtype(inputs.dtype).itemsize
    sublane = {4: 8, 2: 16, 1: 32}.get(itemsize, 8)

    # Batch tile: multiple of the dtype sublane pack; partial edge blocks are fine
    # because rows are independent and padded rows are sliced away below.
    tile_n = min(max_tile_n, _round_up(n, sublane))
    # Guarantee >= 2 batch tiles when possible so v7x's second TensorCore gets work.
    if pl.cdiv(n, tile_n) < 2 and n > sublane:
        tile_n = max(sublane, _round_up(pl.cdiv(n, 2), sublane))
    # Class tile: full dim when it fits, else a 128-aligned streaming tile
    # (the partial last tile is masked in-kernel against the static remainder).
    tile_c = c if c <= max_tile_c else _round_up(max_tile_c, 128)

    grid_n = pl.cdiv(n, tile_n)
    grid_c = pl.cdiv(c, tile_c)
    n_pad = grid_n * tile_n

    # Target-logit pick done once in XLA (N elements of HBM traffic) instead of a
    # per-tile iota/compare/select/reduce inside the kernel.
    picked = jnp.take_along_axis(
        inputs, targets.astype(jnp.int32).reshape(n, 1), axis=1).astype(jnp.float32)

    kernel = functools.partial(
        _ls_ce_kernel, num_classes=c, tile_c=tile_c, epsilon=float(epsilon))

    cost = pl.CostEstimate(
        flops=6 * n * c,
        transcendentals=n * c,
        bytes_accessed=n * c * itemsize + 2 * n * 4 + n_pad * 4)

    per_row = pl.pallas_call(
        kernel,
        out_shape=jax.ShapeDtypeStruct((n_pad, 1), jnp.float32),
        grid=(grid_n, grid_c),
        in_specs=[
            pl.BlockSpec((tile_n, tile_c), lambda i, j: (i, j)),   # logits tile
            pl.BlockSpec((tile_n, 1), lambda i, j: (i, 0)),        # picked target logit
        ],
        out_specs=pl.BlockSpec((tile_n, 1), lambda i, j: (i, 0)),  # per-row loss
        scratch_shapes=[
            pltpu.VMEM((tile_n, 1), jnp.float32),  # running max
            pltpu.VMEM((tile_n, 1), jnp.float32),  # running sum-exp
            pltpu.VMEM((tile_n, 1), jnp.float32),  # running sum of logits
        ],
        compiler_params=pltpu.CompilerParams(
            dimension_semantics=("parallel", "arbitrary"),
            vmem_limit_bytes=_vmem_limit_bytes(),
        ),
        cost_estimate=cost,
    )(inputs, picked)

    # Tiny XLA-side finalize: sum valid rows, single 1/N scale (the mean over batch).
    return jnp.sum(per_row[:n, 0]) * (1.0 / n)


def _reference(inputs, targets, num_classes, epsilon):
    log_probs = jax.nn.log_softmax(inputs.astype(jnp.float32), axis=1)
    onehot = jax.nn.one_hot(targets, num_classes, dtype=jnp.float32)
    tgt = (1.0 - epsilon) * onehot + epsilon / num_classes
    return (-tgt * log_probs).mean(0).sum()


if __name__ == "__main__":
    key = jax.random.PRNGKey(0)
    k1, k2, k3, k4, k5, k6 = jax.random.split(key, 6)
    eps = 0.1

    # --- test 1: toy shape, single full-width class block, f32 ---
    nc1, b1 = 10, 8
    x1 = jax.random.normal(k1, (b1, nc1), dtype=jnp.float32)
    t1 = jax.random.randint(k2, (b1,), 0, nc1, dtype=jnp.int32)
    out1 = jax.block_until_ready(
        cross_entropy_label_smooth(x1, t1, num_classes=nc1, epsilon=eps))
    ref1 = _reference(x1, t1, nc1, eps)
    assert jnp.allclose(out1, ref1, rtol=1e-5, atol=1e-5), (out1, ref1)

    # --- test 2: multi class tiles with a partial (masked) last tile + 2 batch tiles, f32 ---
    nc2, b2 = 300, 20
    x2 = jax.random.normal(k3, (b2, nc2), dtype=jnp.float32)
    t2 = jax.random.randint(k4, (b2,), 0, nc2, dtype=jnp.int32)
    out2 = jax.block_until_ready(
        cross_entropy_label_smooth(x2, t2, num_classes=nc2, epsilon=eps,
                                   max_tile_c=128))  # force multi-tile class axis
    ref2 = _reference(x2, t2, nc2, eps)
    assert jnp.allclose(out2, ref2, rtol=1e-5, atol=1e-5), (out2, ref2)

    # --- test 3: bf16 logits, exact class-tile divide (mask-free fast path),
    #     16-row sublane rounding, 2 batch tiles ---
    nc3, b3 = 256, 24
    x3 = jax.random.normal(k5, (b3, nc3), dtype=jnp.bfloat16)
    t3 = jax.random.randint(k6, (b3,), 0, nc3, dtype=jnp.int32)
    out3 = jax.block_until_ready(
        cross_entropy_label_smooth(x3, t3, num_classes=nc3, epsilon=eps,
                                   max_tile_c=128))
    ref3 = _reference(x3, t3, nc3, eps)
    assert jnp.allclose(out3, ref3, rtol=1e-4, atol=1e-4), (out3, ref3)

    print("KERNEL_OK")
</pallas_src>

<mosaic_0001>
module attributes {stable_mosaic.version = 11 : i64} {
  func.func @_ls_ce_kernel(%arg0: i32, %arg1: i32, %arg2: memref<8x10xf32, #tpu.memory_space<vmem>>, %arg3: memref<8x1xf32, #tpu.memory_space<vmem>>, %arg4: memref<8x1xf32, #tpu.memory_space<vmem>>, %arg5: memref<8x1xf32, #tpu.memory_space<vmem>>, %arg6: memref<8x1xf32, #tpu.memory_space<vmem>>, %arg7: memref<8x1xf32, #tpu.memory_space<vmem>>) attributes {dimension_semantics = [#tpu.dimension_semantics<parallel>, #tpu.dimension_semantics<arbitrary>], iteration_bounds = array<i64: 1, 1>, scalar_prefetch = 0 : i64, scratch_operands = 3 : i64, tpu.core_type = #tpu.core_type<tc>, window_params = [{transform_indices = @transform_0, window_bounds = array<i64: 8, 10>}, {transform_indices = @transform_1, window_bounds = array<i64: 8, 1>}, {transform_indices = @transform_2, window_bounds = array<i64: 8, 1>}]} {
    %c0_i32 = arith.constant 0 : i32
    %0 = arith.cmpi eq, %arg1, %c0_i32 : i32
    %1 = arith.extui %0 : i1 to i32
    %c0_i32_0 = arith.constant 0 : i32
    %2 = arith.cmpi ne, %1, %c0_i32_0 : i32
    scf.if %2 {
      %cst_18 = arith.constant -1.000000e+30 : f32
      %28 = vector.broadcast %cst_18 : f32 to vector<8x1xf32>
      %c0_19 = arith.constant 0 : index
      %c0_20 = arith.constant 0 : index
      %29 = vector.load %arg5[%c0_19, %c0_20] : memref<8x1xf32, #tpu.memory_space<vmem>>, vector<8x1xf32>
      tpu.vector_store %arg5[%c0_19, %c0_20], %28 {strides = array<i32>} : memref<8x1xf32, #tpu.memory_space<vmem>>, vector<8x1xf32>,
      %cst_21 = arith.constant 0.000000e+00 : f32
      %30 = vector.broadcast %cst_21 : f32 to vector<8x1xf32>
      %c0_22 = arith.constant 0 : index
      %c0_23 = arith.constant 0 : index
      %31 = vector.load %arg6[%c0_22, %c0_23] : memref<8x1xf32, #tpu.memory_space<vmem>>, vector<8x1xf32>
      tpu.vector_store %arg6[%c0_22, %c0_23], %30 {strides = array<i32>} : memref<8x1xf32, #tpu.memory_space<vmem>>, vector<8x1xf32>,
      %cst_24 = arith.constant 0.000000e+00 : f32
      %32 = vector.broadcast %cst_24 : f32 to vector<8x1xf32>
      %c0_25 = arith.constant 0 : index
      %c0_26 = arith.constant 0 : index
      %33 = vector.load %arg7[%c0_25, %c0_26] : memref<8x1xf32, #tpu.memory_space<vmem>>, vector<8x1xf32>
      tpu.vector_store %arg7[%c0_25, %c0_26], %32 {strides = array<i32>} : memref<8x1xf32, #tpu.memory_space<vmem>>, vector<8x1xf32>,
    } else {
    }
    %c0 = arith.constant 0 : index
    %c0_1 = arith.constant 0 : index
    %3 = vector.load %arg2[%c0, %c0_1] : memref<8x10xf32, #tpu.memory_space<vmem>>, vector<8x10xf32>
    %c0_2 = arith.constant 0 : index
    %c0_3 = arith.constant 0 : index
    %4 = vector.load %arg5[%c0_2, %c0_3] : memref<8x1xf32, #tpu.memory_space<vmem>>, vector<8x1xf32>
    %cst = arith.constant dense<0xFF800000> : vector<8xf32>
    %5 = vector.multi_reduction <maximumf>, %3, %cst [1] : vector<8x10xf32> to vector<8xf32>
    %6 = vector.shape_cast %5 : vector<8xf32> to vector<8x1xf32>
    %7 = arith.maximumf %4, %6 : vector<8x1xf32>
    %8 = vector.broadcast %7 : vector<8x1xf32> to vector<8x10xf32>
    %9 = arith.subf %3, %8 : vector<8x10xf32>
    %10 = math.exp %9 : vector<8x10xf32>
    %c0_4 = arith.constant 0 : index
    %c0_5 = arith.constant 0 : index
    %11 = vector.load %arg6[%c0_4, %c0_5] : memref<8x1xf32, #tpu.memory_space<vmem>>, vector<8x1xf32>
    %12 = arith.subf %4, %7 : vector<8x1xf32>
    %13 = math.exp %12 : vector<8x1xf32>
    %14 = arith.mulf %11, %13 : vector<8x1xf32>
    %cst_6 = arith.constant dense<0.000000e+00> : vector<8xf32>
    %15 = vector.multi_reduction <add>, %10, %cst_6 [1] : vector<8x10xf32> to vector<8xf32>
    %16 = vector.shape_cast %15 : vector<8xf32> to vector<8x1xf32>
    %17 = arith.addf %14, %16 : vector<8x1xf32>
    %c0_7 = arith.constant 0 : index
    %c0_8 = arith.constant 0 : index
    %18 = vector.load %arg6[%c0_7, %c0_8] : memref<8x1xf32, #tpu.memory_space<vmem>>, vector<8x1xf32>
    tpu.vector_store %arg6[%c0_7, %c0_8], %17 {strides = array<i32>} : memref<8x1xf32, #tpu.memory_space<vmem>>, vector<8x1xf32>,
    %c0_9 = arith.constant 0 : index
    %c0_10 = arith.constant 0 : index
    %19 = vector.load %arg5[%c0_9, %c0_10] : memref<8x1xf32, #tpu.memory_space<vmem>>, vector<8x1xf32>
    tpu.vector_store %arg5[%c0_9, %c0_10], %7 {strides = array<i32>} : memref<8x1xf32, #tpu.memory_space<vmem>>, vector<8x1xf32>,
    %c0_11 = arith.constant 0 : index
    %c0_12 = arith.constant 0 : index
    %20 = vector.load %arg7[%c0_11, %c0_12] : memref<8x1xf32, #tpu.memory_space<vmem>>, vector<8x1xf32>
    %cst_13 = arith.constant dense<0.000000e+00> : vector<8xf32>
    %21 = vector.multi_reduction <add>, %3, %cst_13 [1] : vector<8x10xf32> to vector<8xf32>
    %22 = vector.shape_cast %21 : vector<8xf32> to vector<8x1xf32>
    %23 = arith.addf %20, %22 : vector<8x1xf32>
    %c0_14 = arith.constant 0 : index
    %c0_15 = arith.constant 0 : index
    %24 = vector.load %arg7[%c0_14, %c0_15] : memref<8x1xf32, #tpu.memory_space<vmem>>, vector<8x1xf32>
    tpu.vector_store %arg7[%c0_14, %c0_15], %23 {strides = array<i32>} : memref<8x1xf32, #tpu.memory_space<vmem>>, vector<8x1xf32>,
    %c0_i32_16 = arith.constant 0 : i32
    %25 = arith.cmpi eq, %arg1, %c0_i32_16 : i32
    %26 = arith.extui %25 : i1 to i32
    %c0_i32_17 = arith.constant 0 : i32
    %27 = arith.cmpi ne, %26, %c0_i32_17 : i32
    scf.if %27 {
      %c0_18 = arith.constant 0 : index
      %c0_19 = arith.constant 0 : index
      %28 = vector.load %arg5[%c0_18, %c0_19] : memref<8x1xf32, #tpu.memory_space<vmem>>, vector<8x1xf32>
      %c0_20 = arith.constant 0 : index
      %c0_21 = arith.constant 0 : index
      %29 = vector.load %arg6[%c0_20, %c0_21] : memref<8x1xf32, #tpu.memory_space<vmem>>, vector<8x1xf32>
      %30 = math.log %29 : vector<8x1xf32>
      %31 = arith.addf %28, %30 : vector<8x1xf32>
      %c0_22 = arith.constant 0 : index
      %c0_23 = arith.constant 0 : index
      %32 = vector.load %arg3[%c0_22, %c0_23] : memref<8x1xf32, #tpu.memory_space<vmem>>, vector<8x1xf32>
      %33 = arith.subf %32, %31 : vector<8x1xf32>
      %cst_24 = arith.constant -0.899999976 : f32
      %34 = vector.broadcast %cst_24 : f32 to vector<8x1xf32>
      %35 = arith.mulf %34, %33 : vector<8x1xf32>
      %c0_25 = arith.constant 0 : index
      %c0_26 = arith.constant 0 : index
      %36 = vector.load %arg7[%c0_25, %c0_26] : memref<8x1xf32, #tpu.memory_space<vmem>>, vector<8x1xf32>
      %cst_27 = arith.constant 1.000000e+01 : f32
      %37 = vector.broadcast %cst_27 : f32 to vector<8x1xf32>
      %38 = arith.mulf %37, %31 : vector<8x1xf32>
      %39 = arith.subf %36, %38 : vector<8x1xf32>
      %cst_28 = arith.constant 0.00999999977 : f32
      %40 = vector.broadcast %cst_28 : f32 to vector<8x1xf32>
      %41 = arith.mulf %40, %39 : vector<8x1xf32>
      %42 = arith.subf %35, %41 : vector<8x1xf32>
      %c0_29 = arith.constant 0 : index
      %c0_30 = arith.constant 0 : index
      %43 = vector.load %arg4[%c0_29, %c0_30] : memref<8x1xf32, #tpu.memory_space<vmem>>, vector<8x1xf32>
      tpu.vector_store %arg4[%c0_29, %c0_30], %42 {strides = array<i32>} : memref<8x1xf32, #tpu.memory_space<vmem>>, vector<8x1xf32>,
    } else {
    }
    return
  }
  func.func @transform_0(%arg0: i32, %arg1: i32) -> (i32, i32) {
    %c0_i32 = arith.constant 0 : i32
    return %arg0, %arg1 : i32, i32
  }
  func.func @transform_1(%arg0: i32, %arg1: i32) -> (i32, i32) {
    %c0_i32 = arith.constant 0 : i32
    %c0_i32_0 = arith.constant 0 : i32
    return %arg0, %c0_i32 : i32, i32
  }
  func.func @transform_2(%arg0: i32, %arg1: i32) -> (i32, i32) {
    %c0_i32 = arith.constant 0 : i32
    %c0_i32_0 = arith.constant 0 : i32
    return %arg0, %c0_i32 : i32, i32
  }
}

</mosaic_0001>

<bundles_post_ra>
// kernel: tpu_custom_call.1
= control target key start
LH: loop header
LB: loop body
LE: loop exit
PB: predicated region body
PF: predicated region fallthrough
CT: control target
= control target key end

     0   :  { %vm21_vm0 = vcmask 80896   ;;  %vm15_vm1 = vcmask 7168   ;;  %v83_v1 = vmov -1e+30   ;;  %v84_v3 = vmov 0   ;;  %s120_s0 = inlined_call_operand.vmem [shape: f32[8,10], index: 0, kind: input, shape index: {}]   ;;  %s121_s1 = inlined_call_operand.vmem [shape: f32[8,1], index: 1, kind: input, shape index: {}]   ;;  %s122_s2 = inlined_call_operand.vmem [shape: f32[8,1], index: 2, kind: output, shape index: {}]  }
   0x1   :  { %v19_v0 = vld [vmem:[%s120_s0] sm:$0xff]  ;;  %16 = vst.msk [vmem:[#allocation2] sm:$0xff] %vm15_vm1, %v83_v1  ;;  %76 = vset.pattern.permute.xlu0 %v84_v3  ;;  %v85_v4 = vmov 0.0  }
   0x2   :  { %v22_v2 = vsel %vm21_vm0, %v19_v0, -inf  ;;  %17 = vst.msk [vmem:[#allocation3] sm:$0xff] %vm15_vm1, %v85_v4  ;;  %18 = vst.msk [vmem:[#allocation4] sm:$0xff] %vm15_vm1, %v85_v4  ;;  %v47_v14 = vsel %vm21_vm0, %v19_v0, 0.0  ;;  %v60_v28 = vld [vmem:[%s121_s1] sm:$0xff] }
   0x3   :  { %23 = vmax.xlane.f32.xlu0 %v22_v2 }
   0x8   :  { %v20_v5 = vld [vmem:[#allocation2] sm:$0xff] }
   0x9   :  { %v34_v17 = vld [vmem:[#allocation3] sm:$0xff]  ;;  %v46_v21 = vld [vmem:[#allocation4] sm:$0xff] }
  0x8c   :  { %v24_v6 = vpop.xlane.xlu0 %23 }
  0x8d   :  { %v25_v7 = vmax.f32 %v20_v5, %v24_v6 }
  0x8f   :  { %v35_v8 = vsub.f32 %v20_v5, %v25_v7  ;;  %45 = vst.msk [vmem:[#allocation2] sm:$0xff] %vm15_vm1, %v25_v7  ;;  %28 = vperm.xlu0 %76, %v25_v7  }
  0x91   :  { %v36_v15 = vmul.f32 1.442695, %v35_v8 }
  0x96   :  { %v55_v27 = vld [vmem:[#allocation2] sm:$0xff] }
 0x10a   :  { %v29_v9 = vpop.permute.xlu0 %28 }
 0x10b   :  { %v31_v10 = vsub.f32 %v19_v0, %v29_v9 }
 0x10d   :  { %v32_v11 = vmul.f32 1.442695, %v31_v10 }
 0x10f   :  { %77 = vpow2.f32 %v32_v11 }
 0x110   :  { %79 = vpow2.f32 %v36_v15 }
 0x11c   :  { %v78_v12 = vpop.eup %77 }
 0x11d   :  { %v39_v13 = vsel %vm21_vm0, %v78_v12, 0.0  ;;  %v80_v16 = vpop.eup %79 }
 0x11e   :  { %40 = vadd.xlane.f32.xlu1 %v39_v13  ;;  %v38_v18 = vmul.f32 %v80_v16, %v34_v17 }
 0x122   :  { %48 = vadd.xlane.f32.xlu1 %v47_v14 }
 0x1a7   :  { %v41_v19 = vpop.xlane.xlu1 %40 }
 0x1a8   :  { %v42_v20 = vadd.f32 %v41_v19, %v38_v18 }
 0x1aa   :  { %44 = vst.msk [vmem:[#allocation3] sm:$0xff] %vm15_vm1, %v42_v20 }
 0x1ab   :  { %v49_v22 = vpop.xlane.xlu1 %48 }
 0x1ac   :  { %v50_v23 = vadd.f32 %v49_v22, %v46_v21 }
 0x1ae   :  { %51 = vst.msk [vmem:[#allocation4] sm:$0xff] %vm15_vm1, %v50_v23 }
 0x1b1   :  { %v56_v24 = vld [vmem:[#allocation3] sm:$0xff] }
 0x1b2   :  { %81 = vlog2.f32 %v56_v24 }
 0x1b5   :  { %v63_v30 = vld [vmem:[#allocation4] sm:$0xff] }
 0x1bf   :  { %v82_v25 = vpop.eup %81 }
 0x1c0   :  { %v58_v26 = vmul.f32 0.6931472, %v82_v25 }
 0x1c2   :  { %v59_v29 = vadd.f32 %v58_v26, %v55_v27 }
 0x1c4   :  { %v61_v31 = vsub.f32 %v60_v28, %v59_v29  ;;  %v64_v32 = vmul.f32 10.0, %v59_v29 }
 0x1c6   :  { %v65_v33 = vsub.f32 %v63_v30, %v64_v32  ;;  %v62_v34 = vmul.f32 -0.9, %v61_v31 }
 0x1c8   :  { %v66_v35 = vmul.f32 0.01, %v65_v33 }
 0x1ca   :  { %v67_v36 = vsub.f32 %v62_v34, %v66_v35 }
 0x1cc   :  { %68 = vst.msk [vmem:[%s122_s2] sm:$0xff] %vm15_vm1, %v67_v36 }

</bundles_post_ra>
